<compile_context>
chip_gen: v6e
topology: v6e:2x2x1
jax: 0.10.0
libtpu: 0.0.40
codegen_flags: <defaults>
</compile_context>

<pallas_src>
import functools

import jax
import jax.numpy as jnp
from jax.experimental import pallas as pl
from jax.experimental.pallas import tpu as pltpu


def proto_loss_kernel(x_ref, q_ref, labels_ref, out_ref,
                      *, num_classes, num_support, num_queries, ndim):
    C, S, Q, D = num_classes, num_support, num_queries, ndim
    M = C * Q

    x = x_ref[...]              # [C*S, D] f32 support embeddings
    q = q_ref[...]              # [M,   D] f32 query embeddings
    labels = labels_ref[...]    # [M,   1] int32 true class index per query

    # --- prototypes: per-class mean over the support set (MXU pooling matmul)
    # pool[c, n] = 1/S  iff  support row n belongs to class c.
    col = jax.lax.broadcasted_iota(jnp.int32, (C, C * S), 1)
    row = jax.lax.broadcasted_iota(jnp.int32, (C, C * S), 0)
    in_class = (col >= row * S) & (col < (row + 1) * S)
    pool = jnp.where(in_class, jnp.float32(1.0 / S), jnp.float32(0.0))
    protox = jnp.dot(pool, x, preferred_element_type=jnp.float32)   # [C, D]

    # --- negative squared distances (query-major), via matmul expansion ----
    # -dists^T[m, c] = -(||q_m||^2 + ||p_c||^2 - 2 q_m.p_c)
    # The per-row ||q_m||^2 constant cancels in log_softmax over c and in the
    # argmax over c, so we omit it:  neg[m, c] = 2 q_m.p_c - ||p_c||^2.
    qp = jax.lax.dot_general(q, protox,
                             dimension_numbers=(((1,), (1,)), ((), ())),
                             preferred_element_type=jnp.float32)    # [M, C]
    p_sq = jnp.sum(protox * protox, axis=1)                         # [C]
    neg = 2.0 * qp - p_sq[None, :]                                  # [M, C]

    # --- log_softmax over the class axis -----------------------------------
    # torch: log_softmax(-dists, dim=0).transpose(1,0) == log_softmax(neg, -1)
    mx = jnp.max(neg, axis=1, keepdims=True)                        # [M, 1]
    lse = mx + jnp.log(jnp.sum(jnp.exp(neg - mx), axis=1, keepdims=True))
    logpy = neg - lse                                               # [M, C]

    # --- cross-entropy ------------------------------------------------------
    # torch: -mean(mean(logpy * labels_onehot, dim=1)) over the [C, Q, C] view
    #      == -sum_m logpy[m, label_m] / (C * C * Q)   (one-hot labels)
    cls_iota = jax.lax.broadcasted_iota(jnp.int32, (M, C), 1)
    true_mask = cls_iota == labels                                  # [M, C]
    ce_loss = -jnp.sum(jnp.where(true_mask, logpy, 0.0)) / jnp.float32(C * C * Q)

    # --- accuracy (argmax over class axis, first-occurrence tie-break) -----
    # logpy row-argmax <=> neg row-argmax (same per-row shift), so reuse mx.
    pred = jnp.min(jnp.where(neg == mx, cls_iota, C), axis=1, keepdims=True)
    acc = jnp.mean((pred == labels).astype(jnp.float32))

    out_ref[0, 0] = ce_loss
    out_ref[0, 1] = acc


def proto_loss(x, q, labels_onehot, *, num_classes, num_support, num_queries, ndim):
    """Pallas wrapper. Returns (ce_loss, accuracy) as f32 scalars.

    Assumes `labels_onehot` is one-hot over its last axis (as in the PyTorch
    usage); it is converted to int32 class indices so the kernel never DMAs
    the full one-hot matrix.
    """
    M = num_classes * num_queries
    labels_idx = jnp.argmax(
        labels_onehot.reshape(M, num_classes), axis=-1
    ).astype(jnp.int32).reshape(M, 1)

    kernel = functools.partial(
        proto_loss_kernel,
        num_classes=num_classes, num_support=num_support,
        num_queries=num_queries, ndim=ndim)

    out = pl.pallas_call(
        kernel,
        out_shape=jax.ShapeDtypeStruct((1, 2), jnp.float32),
        in_specs=[pl.BlockSpec(memory_space=pltpu.MemorySpace.VMEM)] * 3,
        out_specs=pl.BlockSpec(memory_space=pltpu.MemorySpace.SMEM),
    )(x.astype(jnp.float32), q.astype(jnp.float32), labels_idx)
    return out[0, 0], out[0, 1]


def proto_loss_ref(x, q, labels_onehot, *, num_classes, num_support, num_queries, ndim):
    """Pure-JAX reference mirroring the PyTorch forward exactly."""
    C, S, Q, D = num_classes, num_support, num_queries, ndim
    protox = jnp.mean(x.reshape(C, S, D), axis=1)                       # [C, D]
    dists = jnp.sum((protox[:, None, :] - q[None, :, :]) ** 2, axis=2)  # [C, M]
    logpy = jax.nn.log_softmax(-dists, axis=0).T.reshape(C, Q, C)
    ce = -jnp.mean(jnp.mean(logpy * labels_onehot, axis=1))
    acc = jnp.mean((jnp.argmax(labels_onehot, -1) == jnp.argmax(logpy, -1))
                   .astype(jnp.float32))
    return ce, acc


if __name__ == "__main__":
    num_classes, num_support, num_queries, ndim = 4, 4, 4, 32

    key = jax.random.PRNGKey(0)
    kx, kq = jax.random.split(key)
    x = jax.random.normal(kx, (num_classes * num_support, ndim), dtype=jnp.float32)
    q = jax.random.normal(kq, (num_classes * num_queries, ndim), dtype=jnp.float32)
    # one-hot labels: query block c is labelled class c
    labels_onehot = jnp.tile(jnp.eye(num_classes, dtype=jnp.float32)[:, None, :],
                             (1, num_queries, 1))                       # [C, Q, C]

    loss, acc = proto_loss(x, q, labels_onehot,
                           num_classes=num_classes, num_support=num_support,
                           num_queries=num_queries, ndim=ndim)
    loss = jax.block_until_ready(loss)
    acc = jax.block_until_ready(acc)

    ref_loss, ref_acc = proto_loss_ref(x, q, labels_onehot,
                                       num_classes=num_classes,
                                       num_support=num_support,
                                       num_queries=num_queries, ndim=ndim)

    assert jnp.allclose(loss, ref_loss, rtol=1e-5, atol=1e-5), (loss, ref_loss)
    assert jnp.allclose(acc, ref_acc, rtol=1e-5, atol=1e-5), (acc, ref_acc)
    print("KERNEL_OK")
</pallas_src>

<mosaic_0001>
module attributes {stable_mosaic.version = 11 : i64} {
  func.func @proto_loss_kernel(%arg0: memref<16x32xf32, #tpu.memory_space<vmem>>, %arg1: memref<16x32xf32, #tpu.memory_space<vmem>>, %arg2: memref<16x1xi32, #tpu.memory_space<vmem>>, %arg3: memref<1x2xf32, #tpu.memory_space<smem>>) attributes {dimension_semantics = [], scalar_prefetch = 0 : i64, scratch_operands = 0 : i64, tpu.core_type = #tpu.core_type<tc>} {
    %c0 = arith.constant 0 : index
    %c0_0 = arith.constant 0 : index
    %0 = vector.load %arg0[%c0, %c0_0] : memref<16x32xf32, #tpu.memory_space<vmem>>, vector<16x32xf32>
    %c0_1 = arith.constant 0 : index
    %c0_2 = arith.constant 0 : index
    %1 = vector.load %arg1[%c0_1, %c0_2] : memref<16x32xf32, #tpu.memory_space<vmem>>, vector<16x32xf32>
    %c0_3 = arith.constant 0 : index
    %c0_4 = arith.constant 0 : index
    %2 = vector.load %arg2[%c0_3, %c0_4] : memref<16x1xi32, #tpu.memory_space<vmem>>, vector<16x1xi32>
    %3 = tpu.iota {dimensions = array<i32: 1>} : vector<4x16xi32>
    %4 = tpu.iota {dimensions = array<i32: 0>} : vector<4x16xi32>
    %c4_i32 = arith.constant 4 : i32
    %5 = vector.broadcast %c4_i32 : i32 to vector<4x16xi32>
    %6 = arith.muli %4, %5 : vector<4x16xi32>
    %7 = arith.cmpi sge, %3, %6 : vector<4x16xi32>
    %c1_i32 = arith.constant 1 : i32
    %8 = vector.broadcast %c1_i32 : i32 to vector<4x16xi32>
    %9 = arith.addi %4, %8 : vector<4x16xi32>
    %c4_i32_5 = arith.constant 4 : i32
    %10 = vector.broadcast %c4_i32_5 : i32 to vector<4x16xi32>
    %11 = arith.muli %9, %10 : vector<4x16xi32>
    %12 = arith.cmpi slt, %3, %11 : vector<4x16xi32>
    %13 = arith.andi %7, %12 : vector<4x16xi1>
    %cst = arith.constant 2.500000e-01 : f32
    %cst_6 = arith.constant 0.000000e+00 : f32
    %14 = vector.broadcast %cst : f32 to vector<4x16xf32>
    %15 = vector.broadcast %cst_6 : f32 to vector<4x16xf32>
    %16 = arith.select %13, %14, %15 : vector<4x16xi1>, vector<4x16xf32>
    %cst_7 = arith.constant dense<0.000000e+00> : vector<4x32xf32>
    %17 = tpu.matmul %16, %0, %cst_7 {dimension_numbers = #tpu.dot_dimension_numbers<[1], [0], [0], [1], [0, 0, 1, 1], [], []>} : vector<4x16xf32>, vector<16x32xf32>, vector<4x32xf32> -> vector<4x32xf32>
    %cst_8 = arith.constant dense<0.000000e+00> : vector<16x4xf32>
    %18 = tpu.matmul %1, %17, %cst_8 {dimension_numbers = #tpu.dot_dimension_numbers<[1], [1], [0], [0], [0, 0, 1, 0], [], []>} : vector<16x32xf32>, vector<4x32xf32>, vector<16x4xf32> -> vector<16x4xf32>
    %19 = arith.mulf %17, %17 : vector<4x32xf32>
    %cst_9 = arith.constant dense<0.000000e+00> : vector<4xf32>
    %20 = vector.multi_reduction <add>, %19, %cst_9 [1] : vector<4x32xf32> to vector<4xf32>
    %cst_10 = arith.constant 2.000000e+00 : f32
    %21 = vector.broadcast %cst_10 : f32 to vector<16x4xf32>
    %22 = arith.mulf %21, %18 : vector<16x4xf32>
    %23 = vector.shape_cast %20 : vector<4xf32> to vector<1x4xf32>
    %24 = vector.broadcast %23 : vector<1x4xf32> to vector<16x4xf32>
    %25 = arith.subf %22, %24 : vector<16x4xf32>
    %cst_11 = arith.constant dense<0xFF800000> : vector<16xf32>
    %26 = vector.multi_reduction <maximumf>, %25, %cst_11 [1] : vector<16x4xf32> to vector<16xf32>
    %27 = vector.shape_cast %26 : vector<16xf32> to vector<16x1xf32>
    %28 = vector.broadcast %27 : vector<16x1xf32> to vector<16x4xf32>
    %29 = arith.subf %25, %28 : vector<16x4xf32>
    %30 = math.exp %29 : vector<16x4xf32>
    %cst_12 = arith.constant dense<0.000000e+00> : vector<16xf32>
    %31 = vector.multi_reduction <add>, %30, %cst_12 [1] : vector<16x4xf32> to vector<16xf32>
    %32 = vector.shape_cast %31 : vector<16xf32> to vector<16x1xf32>
    %33 = math.log %32 : vector<16x1xf32>
    %34 = arith.addf %27, %33 : vector<16x1xf32>
    %35 = vector.broadcast %34 : vector<16x1xf32> to vector<16x4xf32>
    %36 = arith.subf %25, %35 : vector<16x4xf32>
    %37 = tpu.iota {dimensions = array<i32: 1>} : vector<16x4xi32>
    %38 = vector.broadcast %2 : vector<16x1xi32> to vector<16x4xi32>
    %39 = arith.cmpi eq, %37, %38 : vector<16x4xi32>
    %cst_13 = arith.constant 0.000000e+00 : f32
    %40 = vector.broadcast %cst_13 : f32 to vector<16x4xf32>
    %41 = arith.select %39, %36, %40 : vector<16x4xi1>, vector<16x4xf32>
    %42 = vector.shape_cast %41 : vector<16x4xf32> to vector<1x16x4xf32>
    %cst_14 = arith.constant dense<0.000000e+00> : vector<1xf32>
    %43 = vector.multi_reduction <add>, %42, %cst_14 [1, 2] : vector<1x16x4xf32> to vector<1xf32>
    %44 = vector.shape_cast %43 : vector<1xf32> to vector<1x1x1xf32>
    %45 = vector.extract %44[0, 0, 0] : f32 from vector<1x1x1xf32>
    %cst_15 = arith.constant 0.000000e+00 : f32
    %46 = arith.subf %cst_15, %45 : f32
    %cst_16 = arith.constant 6.400000e+01 : f32
    %47 = arith.divf %46, %cst_16 : f32
    %48 = vector.broadcast %27 : vector<16x1xf32> to vector<16x4xf32>
    %49 = arith.cmpf oeq, %25, %48 : vector<16x4xf32>
    %c4_i32_17 = arith.constant 4 : i32
    %50 = vector.broadcast %c4_i32_17 : i32 to vector<16x4xi32>
    %51 = arith.select %49, %37, %50 : vector<16x4xi1>, vector<16x4xi32>
    %cst_18 = arith.constant dense<2147483647> : vector<16xi32>
    %52 = vector.multi_reduction <minsi>, %51, %cst_18 [1] : vector<16x4xi32> to vector<16xi32>
    %53 = vector.shape_cast %52 : vector<16xi32> to vector<16x1xi32>
    %54 = arith.cmpi eq, %53, %2 : vector<16x1xi32>
    %55 = arith.extui %54 : vector<16x1xi1> to vector<16x1xi32>
    %56 = arith.sitofp %55 : vector<16x1xi32> to vector<16x1xf32>
    %57 = vector.shape_cast %56 : vector<16x1xf32> to vector<1x16x1xf32>
    %cst_19 = arith.constant dense<0.000000e+00> : vector<1xf32>
    %58 = vector.multi_reduction <add>, %57, %cst_19 [1, 2] : vector<1x16x1xf32> to vector<1xf32>
    %59 = vector.shape_cast %58 : vector<1xf32> to vector<1x1x1xf32>
    %60 = vector.extract %59[0, 0, 0] : f32 from vector<1x1x1xf32>
    %cst_20 = arith.constant 1.600000e+01 : f32
    %61 = arith.divf %60, %cst_20 : f32
    %c0_21 = arith.constant 0 : index
    %c0_22 = arith.constant 0 : index
    %62 = memref.load %arg3[%c0_21, %c0_22] : memref<1x2xf32, #tpu.memory_space<smem>>
    memref.store %47, %arg3[%c0_21, %c0_22] : memref<1x2xf32, #tpu.memory_space<smem>>
    %c0_23 = arith.constant 0 : index
    %c1 = arith.constant 1 : index
    %63 = memref.load %arg3[%c0_23, %c1] : memref<1x2xf32, #tpu.memory_space<smem>>
    memref.store %61, %arg3[%c0_23, %c1] : memref<1x2xf32, #tpu.memory_space<smem>>
    return
  }
}

</mosaic_0001>

<bundles_post_ra>
// kernel: tpu_custom_call.1
= control target key start
LH: loop header
LB: loop body
LE: loop exit
PB: predicated region body
PF: predicated region fallthrough
CT: control target
= control target key end

     0   :  { %8 = vsyncpa [#allocation3], 0  ;;  %s521_s0 = inlined_call_operand.vmem [shape: f32[16,32], index: 0, kind: input, shape index: {}]   ;;  %s522_s1 = inlined_call_operand.hbm [shape: f32[16,32], index: 1, kind: input, shape index: {}]   ;;  %s523_s2 = inlined_call_operand.vmem [shape: s32[16,1], index: 2, kind: input, shape index: {}]   ;;  %s524_s3 = inlined_call_operand.hbm [shape: f32[1,2], index: 3, kind: output, shape index: {}]  }
   0x1   :  { %9 = vsyncpa [#allocation4], 0  ;;  %s436_s12 = smov [#allocation2]  }
   0x2   :  { %s17_s13 = sshll.u32 %s436_s12, 4  ;;  %s18_s13 = int_to_ptr.vmem [resolvable:$true] %s17_s13 }
   0x3   :  { %s412_s14 = scalar_lea.vmem %s18_s13, 256  ;;  %p417_p1 = scmp.lt.s32.totalorder %s18_s13, %s18_s13 }
   0x4   :  { %p413_p0 = scmp.ne.s32.totalorder %s18_s13, %s412_s14  ;;  %p418_p2 = scmp.lt.s32.totalorder %s412_s14, %s412_s14 }
   0x6   :  { %p419_p3 = por %p418_p2, %p417_p1 }
   0x8   :  { %p420_p4 = pnand %p419_p3, %p413_p0 }
   0xa   :  { %423 = shalt.err (!%p420_p4)
}
   0xb   :  { %s437_s15 = smov 128   ;;  %s438_s16 = smov 8  }
   0xc   :  { %23 = dma.hbm_to_vmem [thread:$0]  %s522_s1, 256, %s18_s13, [#allocation3], %s437_s15, %s437_s15, %s438_s16  }
   0xd   :  { %432 = dma.done.wait [#allocation3], 256  }
   0xe   :  { %433 = vsyncadd [#allocation3], 4294967040  ;;  %v35_v0 = vlaneseq  ;;  %v439_v1 = vmov 0.0   ;;  %vm440_vm0 = vmmov 0   ;;  %v30_v7 = vld [vmem:[%s521_s0 + $0x8] sm:$0xff]  ;;  %v29_v8 = vld [vmem:[%s521_s0] sm:$0xff] }
   0xf   :  { %371 = vmatprep.subr.mxu0 %v439_v1  ;;  %375 = vmatprep.mubr.msk.f32.mxu0 %vm440_vm0, %v439_v1  ;;  %vm46_vm3 = vcmask 130048   ;;  %vm120_vm5 = vcmask 261120   ;;  %v31_v10 = vld [vmem:[#allocation2] sm:$0xff]  ;;  %vm206_vm6 = vcmask 257024   ;;  %v32_v14 = vld [vmem:[#allocation2 + $0x8] sm:$0xff]  ;;  %vm232_vm7 = vcmask 31744  }
  0x10   :  { %v468_v2 = vand.u32 127, %v35_v0  ;;  %v38_v3 = vshrl.u32 %v35_v0, 7  ;;  %372 = vmatpush3.msra.mxu0 %v30_v7  ;;  %380 = vmatprep.mubr.msk.f32.mxu1 %vm120_vm5, %v31_v10  ;;  %v441_v45 = vmov 0   ;;  %v33_v54 = vld [vmem:[%s523_s2] sm:$0xff]  ;;  %v34_v55 = vld [vmem:[%s523_s2 + $0x8] sm:$0xff]  ;;  %vm325_vm13 = vcmask 7168  }
  0x11   :  { %373 = vmatprep.subr.mxu0 %v439_v1  ;;  %394 = vset.pattern.permute.xlu1 %v441_v45  ;;  %s442_s29 = smov [#allocation5]  }
  0x12   :  { %v39_v4 = vmul.u32 4, %v38_v3  ;;  %v41_v5 = vadd.s32 1, %v38_v3  ;;  %374 = vmatpush3.msra.mxu0 %v29_v8  ;;  %v215_v16 = vsub.s32 %v468_v2, %v38_v3  ;;  %395 = vset.pattern.permute.xlu0 %v441_v45 }
  0x14   :  { %vm40_vm1 = vcmp.ge.s32.totalorder %v468_v2, %v39_v4  ;;  %v42_v6 = vmul.u32 4, %v41_v5 }
  0x16   :  { %vm43_vm2 = vcmp.lt.s32.totalorder %v468_v2, %v42_v6 }
  0x17   :  { %vm44_vm4 = vmand %vm40_vm1, %vm43_vm2 }
  0x18   :  { %v45_v9 = vsel %vm44_vm4, 0.25, %v439_v1 }
  0x19   :  { %376 = vmatmul.mubr.msk.f32.vlgmr.msra.gmra.mxu0 %vm46_vm3, %v45_v9 }
  0xd9   :  { %v116_v11 = vpop.f32.mrf.mxu0 }
  0xda   :  { %378 = vmatprep.subr.msk.mxu1 %vm120_vm5, %v116_v11  ;;  %v205_v12 = vmul.f32 %v116_v11, %v116_v11 }
  0xdb   :  { %v377_v13 = vpop.f32.mrf.mxu0  ;;  %379 = vmatpush3.xpose.msk.msra.mxu1 %vm120_vm5, %v116_v11 }
  0xdc   :  { %v207_v15 = vsel %vm206_vm6, %v205_v12, 0.0 }
  0xdd   :  { %208 = vadd.xlane.f32.xlu0 %v207_v15 }
  0xde   :  { %381 = vmatmul.mubr.msk.f32.vlgmr.msra.gmra.mxu1 %vm120_vm5, %v32_v14 }
 0x166   :  { %v209_v17 = vpop.xlane.xlu0 %208 }
 0x167   :  { %v216_v19 = vrot.slane %v209_v17, %v215_v16 }
 0x19e   :  { %v382_v18 = vpop.f32.mrf.mxu1 }
 0x19f   :  { %v211_v20 = vmul.f32 2.0, %v382_v18 }
 0x1a0   :  { %v196_v21 = vpop.f32.mrf.mxu1 }
 0x1a1   :  { %v481_v22 = vsub.f32 %v211_v20, %v216_v19  ;;  %v210_v23 = vmul.f32 2.0, %v196_v21 }
 0x1a3   :  { %v483_v24 = vsub.f32 %v210_v23, %v216_v19  ;;  %v236_v25 = vsel %vm232_vm7, %v481_v22, -inf }
 0x1a4   :  { %237 = vmax.xlane.f32.xlu1 %v236_v25 }
 0x1a5   :  { %v233_v26 = vsel %vm232_vm7, %v483_v24, -inf }
 0x1a6   :  { %234 = vmax.xlane.f32.xlu0 %v233_v26 }
 0x22d   :  { %v489_v27 = vpop.xlane.xlu1 %237 }
 0x22e   :  { %v240_v28 = vsub.f32 %v481_v22, %v489_v27  ;;  %vm286_vm8 = vcmp.eq.f32.partialorder %v481_v22, %v489_v27 }
 0x22f   :  { %v235_v29 = vpop.xlane.xlu0 %234  ;;  %v288_v30 = vsel %vm286_vm8, %v468_v2, 4 }
 0x230   :  { %v243_v31 = vmul.f32 1.442695, %v240_v28  ;;  %v239_v32 = vsub.f32 %v483_v24, %v235_v29  ;;  %vm285_vm9 = vcmp.eq.f32.partialorder %v483_v24, %v235_v29  ;;  %v304_v33 = vsel %vm232_vm7, %v288_v30, 2147483647 }
 0x231   :  { %v306_v34 = vshra.s32 %v304_v33, 16  ;;  %v287_v35 = vsel %vm285_vm9, %v468_v2, 4  ;;  %v305_v46 = vand.u32 65535, %v304_v33 }
 0x232   :  { %396 = vpow2.f32 %v243_v31  ;;  %v241_v36 = vmul.f32 1.442695, %v239_v32  ;;  %v289_v37 = vsel %vm232_vm7, %v287_v35, 2147483647 }
 0x233   :  { %v308_v38 = vcvt.s32.f32 %v306_v34  ;;  %v291_v39 = vshra.s32 %v289_v37, 16  ;;  %v290_v47 = vand.u32 65535, %v289_v37  ;;  %v307_v49 = vcvt.s32.f32 %v305_v46 }
 0x234   :  { %398 = vpow2.f32 %v241_v36 }
 0x235   :  { %309 = vmin.xlane.f32.xlu0 %v308_v38  ;;  %v293_v40 = vcvt.s32.f32 %v291_v39  ;;  %v292_v52 = vcvt.s32.f32 %v290_v47 }
 0x237   :  { %294 = vmin.xlane.f32.xlu1 %v293_v40 }
 0x23f   :  { %v397_v41 = vpop.eup %396 }
 0x240   :  { %v248_v42 = vsel %vm232_vm7, %v397_v41, 0.0 }
 0x241   :  { %v399_v43 = vpop.eup %398  ;;  %249 = vadd.xlane.f32.xlu0 %v248_v42 }
 0x242   :  { %v245_v44 = vsel %vm232_vm7, %v399_v43, 0.0 }
 0x243   :  { %246 = vadd.xlane.f32.xlu1 %v245_v44 }
 0x2be   :  { %v310_v48 = vpop.xlane.xlu0 %309 }
 0x2bf   :  { %vm311_vm10 = vcmp.eq.f32.partialorder %v308_v38, %v310_v48  ;;  %v316_v60 = vcvt.f32.s32 %v310_v48 }
 0x2c0   :  { %v295_v50 = vpop.xlane.xlu1 %294  ;;  %v312_v51 = vsel %vm311_vm10, %v307_v49, inf }
 0x2c1   :  { %313 = vmin.xlane.f32.xlu0 %v312_v51  ;;  %vm296_vm11 = vcmp.eq.f32.partialorder %v293_v40, %v295_v50  ;;  %v301_v62 = vcvt.f32.s32 %v295_v50  ;;  %v317_v3 = vshll.u32 %v316_v60, 16 }
 0x2c2   :  { %v297_v53 = vsel %vm296_vm11, %v292_v52, inf }
 0x2c3   :  { %298 = vmin.xlane.f32.xlu1 %v297_v53  ;;  %v302_v7 = vshll.u32 %v301_v62, 16 }
 0x2ca   :  { %v250_v57 = vpop.xlane.xlu0 %249 }
 0x2cc   :  { %v247_v56 = vpop.xlane.xlu1 %246 }
 0x2cd   :  { %400 = vlog2.f32 %v247_v56 }
 0x2ce   :  { %402 = vlog2.f32 %v250_v57 }
 0x2d4   :  { %260 = vperm.xlu1 %394, %v33_v54  }
 0x2d7   :  { %263 = vperm.xlu0 %395, %v34_v55  }
 0x2da   :  { %v401_v58 = vpop.eup %400 }
 0x2db   :  { %v403_v59 = vpop.eup %402  ;;  %v252_v61 = vmul.f32 0.6931472, %v401_v58 }
 0x2dc   :  { %v254_v63 = vmul.f32 0.6931472, %v403_v59 }
 0x2dd   :  { %v255_v6 = vadd.f32 %v252_v61, %v235_v29 }
 0x2de   :  { %v256_v10 = vadd.f32 %v254_v63, %v489_v27 }
 0x2df   :  { %v257_v12 = vsub.f32 %v483_v24, %v255_v6 }
 0x2e0   :  { %v258_v16 = vsub.f32 %v481_v22, %v256_v10 }
 0x34a   :  { %v314_v0 = vpop.xlane.xlu0 %313 }
 0x34b   :  { %v315_v4 = vcvt.f32.s32 %v314_v0 }
 0x34c   :  { %v299_v5 = vpop.xlane.xlu1 %298 }
 0x34d   :  { %v318_v8 = vadd.s32 %v317_v3, %v315_v4  ;;  %v300_v9 = vcvt.f32.s32 %v299_v5 }
 0x34f   :  { %v303_v11 = vadd.s32 %v302_v7, %v300_v9  ;;  %vm320_vm12 = vcmp.eq.s32.totalorder %v318_v8, %v34_v55 }
 0x350   :  { %v261_v13 = vpop.permute.xlu1 %260  ;;  %v364_v14 = vsel %vm320_vm12, 1.0, %v439_v1 }
 0x351   :  { %vm265_vm14 = vcmp.eq.s32.totalorder %v468_v2, %v261_v13  ;;  %vm319_vm15 = vcmp.eq.s32.totalorder %v303_v11, %v33_v54  ;;  %v327_v20 = vsel %vm325_vm13, %v364_v14, 0.0 }
 0x352   :  { %v267_v15 = vsel %vm265_vm14, %v257_v12, 0.0  ;;  %v264_v17 = vpop.permute.xlu0 %263  ;;  %v363_v18 = vsel %vm319_vm15, 1.0, %v439_v1 }
 0x353   :  { %vm266_vm0 = vcmp.eq.s32.totalorder %v468_v2, %v264_v17  ;;  %v326_v19 = vsel %vm325_vm13, %v363_v18, 0.0  ;;  %v269_v24 = vsel %vm232_vm7, %v267_v15, 0.0 }
 0x354   :  { %v268_v21 = vsel %vm266_vm0, %v258_v16, 0.0  ;;  %v328_v23 = vadd.f32 %v327_v20, %v326_v19 }
 0x355   :  { %v270_v25 = vsel %vm232_vm7, %v268_v21, 0.0 }
 0x356   :  { %329 = vadd.xlane.f32.xlu0 %v328_v23  ;;  %v271_v26 = vadd.f32 %v270_v25, %v269_v24 }
 0x358   :  { %272 = vadd.xlane.f32.xlu1 %v271_v26 }
 0x3df   :  { %v330_v27 = vpop.xlane.xlu0 %329 }
 0x3e0   :  { %v331_v28 = vrot.slane %v330_v27, 4 }
 0x3e1   :  { %v273_v29 = vpop.xlane.xlu1 %272 }
 0x3e2   :  { %v332_v22 = vadd.f32 %v331_v28, %v330_v27  ;;  %v274_v30 = vrot.slane %v273_v29, 4 }
 0x3e4   :  { %v333_v31 = vrot.slane %v332_v22, 2  ;;  %v275_v1 = vadd.f32 %v274_v30, %v273_v29 }
 0x3e6   :  { %v334_v32 = vadd.f32 %v333_v31, %v332_v22  ;;  %v276_v2 = vrot.slane %v275_v1, 2 }
 0x3e8   :  { %v277_v33 = vadd.f32 %v276_v2, %v275_v1  ;;  %v335_v34 = vrot.slane %v334_v32, 1 }
 0x3ea   :  { %v278_v35 = vrot.slane %v277_v33, 1  ;;  %v336_v37 = vadd.f32 %v335_v34, %v334_v32 }
 0x3ec   :  { %v279_v36 = vadd.f32 %v278_v35, %v277_v33 }
 0x3ee   :  { %383 = vpush %v279_v36 }
 0x3ef   :  { %385 = vpush %v336_v37 }
 0x41f   :  { %s384_s2 = spop %383 }
 0x420   :  { %s281_s25 = ssub.f32 0.0, %s384_s2  ;;  %s386_s26 = spop %385 }
 0x421   :  { %s340_s27 = smul.f32 0.0625, %s386_s26 }
 0x422   :  { %s284_s28 = smul.f32 0.015625, %s281_s25 }
 0x423   :  { %344 = sst [smem:[#allocation5 + $0x1]] %s340_s27 }
 0x424   :  { %342 = sst [smem:[#allocation5]] %s284_s28 }
 0x425   :  { %352 = dma.smem_to_hbm %s442_s29, 16, %s524_s3, [#allocation4]  }
 0x426   :  { %434 = dma.done.wait [#allocation4], 16  }
 0x427   :  { %435 = vsyncadd [#allocation4], 4294967280 }
 0x428   :  { %356 = sfence }
 0x429   :  { %357 = vsyncpa [#allocation3], 1 }
 0x42a   :  { %358 = vsyncpa [#allocation4], 1 }

</bundles_post_ra>
